<compile_context>
chip_gen: v7x
topology: tpu7x:2x2x1
jax: 0.10.0
libtpu: 0.0.40
codegen_flags: <defaults>
</compile_context>

<pallas_src>
import jax
import jax.numpy as jnp
from jax.experimental import pallas as pl
from jax.experimental.pallas import tpu as pltpu

EPS = 1e-5
OUT_DIM = 12                       # true output width of the model
VMEM_BUDGET = 40 * 1024 * 1024     # keeps comfortable headroom on v7x (64 MiB physical)


def _round_up(n, m):
    return (n + m - 1) // m * m


def lasso_kernel(x_ref,
                 w1_ref, b1_ref,
                 w2_ref, b2_ref,
                 w3_ref, b3_ref,
                 o_ref):
    x = x_ref[...]  # f32 (tile_b, D)

    # ---- LayerNorm over input_size (f32, two-pass variance; affine folded into W1/b1) ----
    mu = jnp.mean(x, axis=-1, keepdims=True)
    var = jnp.mean((x - mu) * (x - mu), axis=-1, keepdims=True)
    xn = (x - mu) * jax.lax.rsqrt(var + EPS)

    # ---- Linear(input_size, 64) + ReLU (bf16 MXU inputs, f32 accumulate) ----
    h = jnp.dot(xn.astype(jnp.bfloat16), w1_ref[...],
                preferred_element_type=jnp.float32) + b1_ref[...]
    h = jnp.maximum(h, 0.0)
    # dropout1: identity (eval mode)

    # ---- LayerNorm over 64 (affine folded into W2/b2) ----
    mu2 = jnp.mean(h, axis=-1, keepdims=True)
    var2 = jnp.mean((h - mu2) * (h - mu2), axis=-1, keepdims=True)
    hn = (h - mu2) * jax.lax.rsqrt(var2 + EPS)

    # ---- Linear(64, 32) + ReLU ----
    h2 = jnp.dot(hn.astype(jnp.bfloat16), w2_ref[...],
                 preferred_element_type=jnp.float32) + b2_ref[...]
    h2 = jnp.maximum(h2, 0.0)
    # dropout2: identity (eval mode)

    # ---- Linear(32, 12) -> narrow (tile_b, 12) store ----
    out = jnp.dot(h2.astype(jnp.bfloat16), w3_ref[...],
                  preferred_element_type=jnp.float32) + b3_ref[...]
    o_ref[...] = out.astype(o_ref.dtype)


def _kernel_vmem_bytes(tile_b, d):
    """Rough upper bound on VMEM needed by one grid step (double-buffered I/O)."""
    io = 2 * tile_b * d * 4 + 2 * tile_b * OUT_DIM * 4            # x / out blocks
    acts = tile_b * (d + 3 * 64 + 2 * 32 + OUT_DIM) * 4           # f32 intermediates
    weights = 2 * (2 * (d * 64 + 64 * 32 + 32 * OUT_DIM)          # bf16 weights (x2 buffers)
                   + 4 * (64 + 32 + OUT_DIM))                     # f32 biases
    return io + acts + weights


def lasso_forward(x, kparams, tile_b=4096):
    """x: (B, input_size) float32. kparams: dict from fold_params(init_params(...))."""
    B, D = x.shape

    # --- tile size selection ---------------------------------------------
    # multiple of 8 (f32 sublane), capped by the batch (rounded up to 8)
    tile_b = max(8, _round_up(int(tile_b), 8))
    tile_b = min(tile_b, _round_up(B, 8))
    # shrink if a generic (large) input_size would overflow a v7x-safe VMEM budget
    while tile_b > 8 and _kernel_vmem_bytes(tile_b, D) > VMEM_BUDGET:
        tile_b = max(8, _round_up(tile_b // 2, 8))
    # keep >= 2 grid blocks so v7x's two TensorCores both get work
    if B > 8 and pl.cdiv(B, tile_b) < 2:
        tile_b = max(8, _round_up(pl.cdiv(B, 2), 8))

    grid = (pl.cdiv(B, tile_b),)   # ragged last block handled by Pallas (rows independent)

    def resident(shape):
        # Weights / biases: same block every grid step -> stay resident in VMEM.
        return pl.BlockSpec(shape, lambda i: (0, 0))

    in_specs = [
        pl.BlockSpec((tile_b, D), lambda i: (i, 0)),   # x (tiled over batch)
        resident((D, 64)), resident((1, 64)),          # w1 (LN1 folded), b1
        resident((64, 32)), resident((1, 32)),         # w2 (LN2 folded), b2
        resident((32, OUT_DIM)), resident((1, OUT_DIM)),  # w3, b3 (unpadded, 12 wide)
    ]
    out_specs = pl.BlockSpec((tile_b, OUT_DIM), lambda i: (i, 0))

    # Advisory cost hint for XLA scheduling.
    flops = 2 * B * (D * 64 + 64 * 32 + 32 * OUT_DIM)
    weight_bytes = (2 * (D * 64 + 64 * 32 + 32 * OUT_DIM)   # bf16 weights
                    + 4 * (64 + 32 + OUT_DIM))              # f32 biases
    bytes_accessed = 4 * B * (D + OUT_DIM) + weight_bytes
    cost = pl.CostEstimate(flops=flops,
                           transcendentals=2 * B,
                           bytes_accessed=bytes_accessed)

    vmem_limit = int(min(56 * 1024 * 1024,
                         max(16 * 1024 * 1024, 2 * _kernel_vmem_bytes(tile_b, D))))

    return pl.pallas_call(
        lasso_kernel,
        out_shape=jax.ShapeDtypeStruct((B, OUT_DIM), jnp.float32),
        grid=grid,
        in_specs=in_specs,
        out_specs=out_specs,
        compiler_params=pltpu.CompilerParams(
            dimension_semantics=("parallel",),
            vmem_limit_bytes=vmem_limit),
        cost_estimate=cost,
    )(x,
      kparams["w1"], kparams["b1"],
      kparams["w2"], kparams["b2"],
      kparams["w3"], kparams["b3"])


def init_params(key, input_size):
    """Synthetic parameters matching LassoModel's shapes (PyTorch layout, f32)."""
    ks = jax.random.split(key, 6)

    def linear(k, fan_in, fan_out):
        kw, kb = jax.random.split(k)
        bound = 1.0 / jnp.sqrt(fan_in)
        w = jax.random.uniform(kw, (fan_in, fan_out), jnp.float32, -bound, bound)
        b = jax.random.uniform(kb, (1, fan_out), jnp.float32, -bound, bound)
        return w, b

    w1, b1 = linear(ks[0], input_size, 64)
    w2, b2 = linear(ks[1], 64, 32)
    w3, b3 = linear(ks[2], 32, OUT_DIM)

    ln1_w = 1.0 + 0.01 * jax.random.normal(ks[3], (1, input_size), jnp.float32)
    ln1_b = 0.01 * jax.random.normal(ks[4], (1, input_size), jnp.float32)
    ln2_w = 1.0 + 0.01 * jax.random.normal(ks[5], (1, 64), jnp.float32)
    ln2_b = jnp.zeros((1, 64), jnp.float32)

    return dict(ln1_w=ln1_w, ln1_b=ln1_b, w1=w1, b1=b1,
                ln2_w=ln2_w, ln2_b=ln2_b, w2=w2, b2=b2,
                w3=w3, b3=b3)


def fold_params(p):
    """One-time prep: fold LayerNorm affine into the following Linear (f32 fold,
    then bf16 cast for MXU-native weights)."""
    D = p["w1"].shape[0]
    w1f = (p["ln1_w"].reshape(D, 1) * p["w1"])                 # diag(gamma1) @ W1
    b1f = p["b1"] + p["ln1_b"] @ p["w1"]                       # b1 + beta1 @ W1
    w2f = (p["ln2_w"].reshape(64, 1) * p["w2"])                # diag(gamma2) @ W2
    b2f = p["b2"] + p["ln2_b"] @ p["w2"]                       # b2 + beta2 @ W2
    return dict(w1=w1f.astype(jnp.bfloat16), b1=b1f.astype(jnp.float32),
                w2=w2f.astype(jnp.bfloat16), b2=b2f.astype(jnp.float32),
                w3=p["w3"].astype(jnp.bfloat16), b3=p["b3"].astype(jnp.float32))


def lasso_forward_ref(x, p):
    """Pure-JAX f32 reference mirroring the PyTorch module (eval mode)."""
    def ln(v, w, b):
        mu = jnp.mean(v, axis=-1, keepdims=True)
        var = jnp.mean((v - mu) ** 2, axis=-1, keepdims=True)
        return (v - mu) / jnp.sqrt(var + EPS) * w + b

    h = ln(x, p["ln1_w"], p["ln1_b"])
    h = jnp.maximum(h @ p["w1"] + p["b1"], 0.0)
    h = ln(h, p["ln2_w"], p["ln2_b"])
    h = jnp.maximum(h @ p["w2"] + p["b2"], 0.0)
    return h @ p["w3"] + p["b3"]


if __name__ == "__main__":
    key = jax.random.PRNGKey(0)
    kx, kp = jax.random.split(key)

    batch = 20          # not a multiple of tile_b -> exercises the ragged last block
    input_size = 32
    x = jax.random.normal(kx, (batch, input_size), jnp.float32)

    params = init_params(kp, input_size)       # PyTorch-style f32 params
    kparams = fold_params(params)               # kernel-ready folded bf16/f32 params

    out = lasso_forward(x, kparams)             # default tile_b -> grid of 2 blocks here
    out = jax.block_until_ready(out)

    ref = lasso_forward_ref(x, params)
    assert out.shape == (batch, OUT_DIM)
    # Tolerance covers the kernel's bf16 MXU inputs vs the f32 reference.
    assert jnp.allclose(out, ref, atol=5e-2, rtol=5e-2), (
        f"mismatch vs JAX reference, max abs err = {jnp.max(jnp.abs(out - ref))}")

    print("KERNEL_OK")
</pallas_src>

<mosaic_0001>
module attributes {stable_mosaic.version = 11 : i64} {
  func.func @lasso_kernel(%arg0: i32, %arg1: memref<16x32xf32, #tpu.memory_space<vmem>>, %arg2: memref<32x64xbf16, #tpu.memory_space<vmem>>, %arg3: memref<1x64xf32, #tpu.memory_space<vmem>>, %arg4: memref<64x32xbf16, #tpu.memory_space<vmem>>, %arg5: memref<1x32xf32, #tpu.memory_space<vmem>>, %arg6: memref<32x12xbf16, #tpu.memory_space<vmem>>, %arg7: memref<1x12xf32, #tpu.memory_space<vmem>>, %arg8: memref<16x12xf32, #tpu.memory_space<vmem>>) attributes {dimension_semantics = [#tpu.dimension_semantics<parallel>], iteration_bounds = array<i64: 2>, scalar_prefetch = 0 : i64, scratch_operands = 0 : i64, tpu.core_type = #tpu.core_type<tc>, window_params = [{transform_indices = @transform_0, window_bounds = array<i64: 16, 32>}, {pipeline_mode = #tpu.pipeline_mode<synchronous>, transform_indices = @transform_1, window_bounds = array<i64: 32, 64>}, {pipeline_mode = #tpu.pipeline_mode<synchronous>, transform_indices = @transform_2, window_bounds = array<i64: 1, 64>}, {pipeline_mode = #tpu.pipeline_mode<synchronous>, transform_indices = @transform_3, window_bounds = array<i64: 64, 32>}, {pipeline_mode = #tpu.pipeline_mode<synchronous>, transform_indices = @transform_4, window_bounds = array<i64: 1, 32>}, {pipeline_mode = #tpu.pipeline_mode<synchronous>, transform_indices = @transform_5, window_bounds = array<i64: 32, 12>}, {pipeline_mode = #tpu.pipeline_mode<synchronous>, transform_indices = @transform_6, window_bounds = array<i64: 1, 12>}, {transform_indices = @transform_7, window_bounds = array<i64: 16, 12>}]} {
    %c0 = arith.constant 0 : index
    %c0_0 = arith.constant 0 : index
    %0 = vector.load %arg1[%c0, %c0_0] : memref<16x32xf32, #tpu.memory_space<vmem>>, vector<16x32xf32>
    %cst = arith.constant dense<0.000000e+00> : vector<16xf32>
    %1 = vector.multi_reduction <add>, %0, %cst [1] : vector<16x32xf32> to vector<16xf32>
    %2 = vector.shape_cast %1 : vector<16xf32> to vector<16x1xf32>
    %cst_1 = arith.constant 3.200000e+01 : f32
    %3 = vector.broadcast %cst_1 : f32 to vector<16x1xf32>
    %4 = arith.divf %2, %3 : vector<16x1xf32>
    %5 = vector.broadcast %4 : vector<16x1xf32> to vector<16x32xf32>
    %6 = arith.subf %0, %5 : vector<16x32xf32>
    %7 = vector.broadcast %4 : vector<16x1xf32> to vector<16x32xf32>
    %8 = arith.subf %0, %7 : vector<16x32xf32>
    %9 = arith.mulf %6, %8 : vector<16x32xf32>
    %cst_2 = arith.constant dense<0.000000e+00> : vector<16xf32>
    %10 = vector.multi_reduction <add>, %9, %cst_2 [1] : vector<16x32xf32> to vector<16xf32>
    %11 = vector.shape_cast %10 : vector<16xf32> to vector<16x1xf32>
    %cst_3 = arith.constant 3.200000e+01 : f32
    %12 = vector.broadcast %cst_3 : f32 to vector<16x1xf32>
    %13 = arith.divf %11, %12 : vector<16x1xf32>
    %14 = vector.broadcast %4 : vector<16x1xf32> to vector<16x32xf32>
    %15 = arith.subf %0, %14 : vector<16x32xf32>
    %cst_4 = arith.constant 9.99999974E-6 : f32
    %16 = vector.broadcast %cst_4 : f32 to vector<16x1xf32>
    %17 = arith.addf %13, %16 : vector<16x1xf32>
    %18 = math.rsqrt %17 : vector<16x1xf32>
    %19 = vector.broadcast %18 : vector<16x1xf32> to vector<16x32xf32>
    %20 = arith.mulf %15, %19 : vector<16x32xf32>
    %21 = arith.truncf %20 : vector<16x32xf32> to vector<16x32xbf16>
    %c0_5 = arith.constant 0 : index
    %c0_6 = arith.constant 0 : index
    %22 = vector.load %arg2[%c0_5, %c0_6] : memref<32x64xbf16, #tpu.memory_space<vmem>>, vector<32x64xbf16>
    %cst_7 = arith.constant dense<0.000000e+00> : vector<16x64xf32>
    %23 = tpu.matmul %21, %22, %cst_7 {dimension_numbers = #tpu.dot_dimension_numbers<[1], [0], [0], [1], [0, 0, 1, 1], [], []>} : vector<16x32xbf16>, vector<32x64xbf16>, vector<16x64xf32> -> vector<16x64xf32>
    %c0_8 = arith.constant 0 : index
    %c0_9 = arith.constant 0 : index
    %24 = vector.load %arg3[%c0_8, %c0_9] : memref<1x64xf32, #tpu.memory_space<vmem>>, vector<1x64xf32>
    %25 = vector.broadcast %24 : vector<1x64xf32> to vector<16x64xf32>
    %26 = arith.addf %23, %25 : vector<16x64xf32>
    %cst_10 = arith.constant 0.000000e+00 : f32
    %27 = vector.broadcast %cst_10 : f32 to vector<16x64xf32>
    %28 = arith.maximumf %26, %27 : vector<16x64xf32>
    %cst_11 = arith.constant dense<0.000000e+00> : vector<16xf32>
    %29 = vector.multi_reduction <add>, %28, %cst_11 [1] : vector<16x64xf32> to vector<16xf32>
    %30 = vector.shape_cast %29 : vector<16xf32> to vector<16x1xf32>
    %cst_12 = arith.constant 6.400000e+01 : f32
    %31 = vector.broadcast %cst_12 : f32 to vector<16x1xf32>
    %32 = arith.divf %30, %31 : vector<16x1xf32>
    %33 = vector.broadcast %32 : vector<16x1xf32> to vector<16x64xf32>
    %34 = arith.subf %28, %33 : vector<16x64xf32>
    %35 = vector.broadcast %32 : vector<16x1xf32> to vector<16x64xf32>
    %36 = arith.subf %28, %35 : vector<16x64xf32>
    %37 = arith.mulf %34, %36 : vector<16x64xf32>
    %cst_13 = arith.constant dense<0.000000e+00> : vector<16xf32>
    %38 = vector.multi_reduction <add>, %37, %cst_13 [1] : vector<16x64xf32> to vector<16xf32>
    %39 = vector.shape_cast %38 : vector<16xf32> to vector<16x1xf32>
    %cst_14 = arith.constant 6.400000e+01 : f32
    %40 = vector.broadcast %cst_14 : f32 to vector<16x1xf32>
    %41 = arith.divf %39, %40 : vector<16x1xf32>
    %42 = vector.broadcast %32 : vector<16x1xf32> to vector<16x64xf32>
    %43 = arith.subf %28, %42 : vector<16x64xf32>
    %cst_15 = arith.constant 9.99999974E-6 : f32
    %44 = vector.broadcast %cst_15 : f32 to vector<16x1xf32>
    %45 = arith.addf %41, %44 : vector<16x1xf32>
    %46 = math.rsqrt %45 : vector<16x1xf32>
    %47 = vector.broadcast %46 : vector<16x1xf32> to vector<16x64xf32>
    %48 = arith.mulf %43, %47 : vector<16x64xf32>
    %49 = arith.truncf %48 : vector<16x64xf32> to vector<16x64xbf16>
    %c0_16 = arith.constant 0 : index
    %c0_17 = arith.constant 0 : index
    %50 = vector.load %arg4[%c0_16, %c0_17] : memref<64x32xbf16, #tpu.memory_space<vmem>>, vector<64x32xbf16>
    %cst_18 = arith.constant dense<0.000000e+00> : vector<16x32xf32>
    %51 = tpu.matmul %49, %50, %cst_18 {dimension_numbers = #tpu.dot_dimension_numbers<[1], [0], [0], [1], [0, 0, 1, 1], [], []>} : vector<16x64xbf16>, vector<64x32xbf16>, vector<16x32xf32> -> vector<16x32xf32>
    %c0_19 = arith.constant 0 : index
    %c0_20 = arith.constant 0 : index
    %52 = vector.load %arg5[%c0_19, %c0_20] : memref<1x32xf32, #tpu.memory_space<vmem>>, vector<1x32xf32>
    %53 = vector.broadcast %52 : vector<1x32xf32> to vector<16x32xf32>
    %54 = arith.addf %51, %53 : vector<16x32xf32>
    %cst_21 = arith.constant 0.000000e+00 : f32
    %55 = vector.broadcast %cst_21 : f32 to vector<16x32xf32>
    %56 = arith.maximumf %54, %55 : vector<16x32xf32>
    %57 = arith.truncf %56 : vector<16x32xf32> to vector<16x32xbf16>
    %c0_22 = arith.constant 0 : index
    %c0_23 = arith.constant 0 : index
    %58 = vector.load %arg6[%c0_22, %c0_23] : memref<32x12xbf16, #tpu.memory_space<vmem>>, vector<32x12xbf16>
    %cst_24 = arith.constant dense<0.000000e+00> : vector<16x12xf32>
    %59 = tpu.matmul %57, %58, %cst_24 {dimension_numbers = #tpu.dot_dimension_numbers<[1], [0], [0], [1], [0, 0, 1, 1], [], []>} : vector<16x32xbf16>, vector<32x12xbf16>, vector<16x12xf32> -> vector<16x12xf32>
    %c0_25 = arith.constant 0 : index
    %c0_26 = arith.constant 0 : index
    %60 = vector.load %arg7[%c0_25, %c0_26] : memref<1x12xf32, #tpu.memory_space<vmem>>, vector<1x12xf32>
    %61 = vector.broadcast %60 : vector<1x12xf32> to vector<16x12xf32>
    %62 = arith.addf %59, %61 : vector<16x12xf32>
    %c0_27 = arith.constant 0 : index
    %c0_28 = arith.constant 0 : index
    %63 = vector.load %arg8[%c0_27, %c0_28] : memref<16x12xf32, #tpu.memory_space<vmem>>, vector<16x12xf32>
    tpu.vector_store %arg8[%c0_27, %c0_28], %62 {strides = array<i32>} : memref<16x12xf32, #tpu.memory_space<vmem>>, vector<16x12xf32>,
    return
  }
  func.func @transform_0(%arg0: i32) -> (i32, i32) {
    %c0_i32 = arith.constant 0 : i32
    %c0_i32_0 = arith.constant 0 : i32
    return %arg0, %c0_i32 : i32, i32
  }
  func.func @transform_1(%arg0: i32) -> (i32, i32) {
    %c0_i32 = arith.constant 0 : i32
    %c0_i32_0 = arith.constant 0 : i32
    %c0_i32_1 = arith.constant 0 : i32
    return %c0_i32, %c0_i32_0 : i32, i32
  }
  func.func @transform_2(%arg0: i32) -> (i32, i32) {
    %c0_i32 = arith.constant 0 : i32
    %c0_i32_0 = arith.constant 0 : i32
    %c0_i32_1 = arith.constant 0 : i32
    return %c0_i32, %c0_i32_0 : i32, i32
  }
  func.func @transform_3(%arg0: i32) -> (i32, i32) {
    %c0_i32 = arith.constant 0 : i32
    %c0_i32_0 = arith.constant 0 : i32
    %c0_i32_1 = arith.constant 0 : i32
    return %c0_i32, %c0_i32_0 : i32, i32
  }
  func.func @transform_4(%arg0: i32) -> (i32, i32) {
    %c0_i32 = arith.constant 0 : i32
    %c0_i32_0 = arith.constant 0 : i32
    %c0_i32_1 = arith.constant 0 : i32
    return %c0_i32, %c0_i32_0 : i32, i32
  }
  func.func @transform_5(%arg0: i32) -> (i32, i32) {
    %c0_i32 = arith.constant 0 : i32
    %c0_i32_0 = arith.constant 0 : i32
    %c0_i32_1 = arith.constant 0 : i32
    return %c0_i32, %c0_i32_0 : i32, i32
  }
  func.func @transform_6(%arg0: i32) -> (i32, i32) {
    %c0_i32 = arith.constant 0 : i32
    %c0_i32_0 = arith.constant 0 : i32
    %c0_i32_1 = arith.constant 0 : i32
    return %c0_i32, %c0_i32_0 : i32, i32
  }
  func.func @transform_7(%arg0: i32) -> (i32, i32) {
    %c0_i32 = arith.constant 0 : i32
    %c0_i32_0 = arith.constant 0 : i32
    return %arg0, %c0_i32 : i32, i32
  }
}

</mosaic_0001>

<bundles_post_ra>
// kernel: tpu_custom_call.1
= control target key start
LH: loop header
LB: loop body
LE: loop exit
PB: predicated region body
PF: predicated region fallthrough
CT: control target
= control target key end

     0   :  { %s1121_s24 = smov 0   ;;  %s1123_s25 = smov 0   ;;  %s1262_s0 = inlined_call_operand.vmem [shape: f32[20,32], index: 0, kind: input, shape index: {}]   ;;  %s1263_s1 = inlined_call_operand.vmem [shape: bf16[32,64], index: 1, kind: input, shape index: {}]   ;;  %s1264_s2 = inlined_call_operand.vmem [shape: f32[1,64], index: 2, kind: input, shape index: {}]   ;;  %s1265_s3 = inlined_call_operand.vmem [shape: bf16[64,32], index: 3, kind: input, shape index: {}]   ;;  %s1266_s4 = inlined_call_operand.vmem [shape: f32[1,32], index: 4, kind: input, shape index: {}]   ;;  %s1267_s5 = inlined_call_operand.vmem [shape: bf16[32,12], index: 5, kind: input, shape index: {}]   ;;  %s1268_s6 = inlined_call_operand.vmem [shape: f32[1,12], index: 6, kind: input, shape index: {}]   ;;  %s1269_s7 = inlined_call_operand.vmem [shape: f32[20,12], index: 7, kind: output, shape index: {}]  }
   0x1   :  { %s1125_s26 = smov 0  }
   0x2 LB: > { %s1134_s27 = sadd.s32 4294967295, %s1045_s26   ;;  %s1136_s28 = sadd.s32 1, %s1045_s26   ;;  %s1045_s26 = sphi %s1125_s26, %s1273_s26   ;;  %s1041_s25 = sphi %s1123_s25, %s1272_s25   ;;  %s1037_s24 = sphi %s1121_s24, %s1271_s24  }
   0x3   : > { %s173_s29 = ssub.s32 %s1045_s26, %s1136_s28  ;;  %s176_s30 = sadd.s32 1, %s1041_s25 }
   0x4   : > { %p174_p0 = scmp.eq.s32.totalorder %s173_s29, 0  ;;  %p186_p1 = scmp.ne.s32.totalorder %s1041_s25, %s1037_s24 }
   0x5   : > { %p187_p2 = scmp.eq.s32.totalorder %s1134_s27, 1  ;;  %p808_p3 = scmp.ge.s32.totalorder %s1045_s26, 1 }
   0x6   : > { %s1144_s8 = scalar_select %p174_p0, %s1041_s25, %s176_s30  }
   0x7   : > { %p1146_p4 = por %p187_p2, %p186_p1  ;;  %p246_p5 = scmp.lt.s32.totalorder %s1045_s26, 3 }
   0x9   : > { %p247_p6 = pnand %p808_p3, %p246_p5 }
   0xa   : > { %s1151_s10 = sshll.u32 (!%p247_p6), %s1134_s27, 1  ;;  %vm303_vm0 = vcmask (!%p247_p6), 261120   ;;  %v975_v14 = vld [vmem:[%s1263_s1] sm:$0xff] (!%p247_p6)   ;;  %v1079_v15 = vmov (!%p247_p6), 0.0   ;;  %vm1080_vm1 = vmmov (!%p247_p6), 0   ;;  %v976_v16 = vld [vmem:[%s1263_s1 + $0x8] sm:$0xff] (!%p247_p6)  }
   0xb   : > { %250 = sbr.rel (%p247_p6) target bundleno = 1353 (0x549), region = 48  ;;  %p286_p7 = scmp.lt.s32.totalorder (!%p247_p6), %s1151_s10, 2  ;;  %857 = vmatprep.subr.bf16.mxu0 (!%p247_p6), %v1079_v15  ;;  %861 = vmatprep.mubr.msk.bf16.mxu0 (!%p247_p6), %vm1080_vm1, %v1079_v15  ;;  %v812_v28 = vld [vmem:[%s1264_s2] ss:$0 sm:$0xff] (!%p247_p6)  ;;  %vm401_vm2 = vcmask (!%p247_p6), 523264   ;;  %v978_v50 = vld [vmem:[%s1265_s3 + $0x8] sm:$0xff] (!%p247_p6)  }
   0xc   : > { %858 = vmatpush3.bf16.msra.mxu0 (!%p247_p6), %v975_v14  ;;  %865 = vmatprep.subr.bf16.mxu1 (!%p247_p6), %v1079_v15  ;;  %v977_v49 = vld [vmem:[%s1265_s3] sm:$0xff] (!%p247_p6)   ;;  %v979_v51 = vld [vmem:[%s1265_s3 + $0x10] sm:$0xff] (!%p247_p6)   ;;  %v980_v52 = vld [vmem:[%s1265_s3 + $0x18] sm:$0xff] (!%p247_p6)   ;;  %s278_s20 = sand.u32 (!%p247_p6), 1, %s1037_s24   ;;  %vm583_vm3 = vcmask (!%p247_p6), 97280  }
   0xd   : > { %859 = vmatprep.subr.bf16.mxu0 (!%p247_p6), %v1079_v15  ;;  %873 = vmatprep.mubr.msk.bf16.mxu1 (!%p247_p6), %vm1080_vm1, %v1079_v15  ;;  %s809_s21 = sshll.u32 (!%p247_p6), %s278_s20, 4 }
   0xe   : > { %866 = vmatpush3.bf16.msra.mxu1 (!%p247_p6), %v977_v49  ;;  %s1217_s26 = scalar_lea.vmem (!%p247_p6), [#allocation2], %s809_s21  }
   0xf   : > { %867 = vmatprep.subr.bf16.mxu1 (!%p247_p6), %v1079_v15 }
  0x10   : > { %860 = vmatpush3.bf16.msra.mxu0 (!%p247_p6), %v976_v16 }
  0x11   : > { %877 = vmatprep.subr.bf16.mxu0 (!%p247_p6), %v1079_v15 }
  0x12   : > { %s287_s11 = scalar_select %p286_p7, %s1151_s10, 2  ;;  %868 = vmatpush3.bf16.msra.mxu1 %v978_v50 }
  0x13   : > { %869 = vmatprep.subr.bf16.mxu1 %v1079_v15  ;;  %s594_s24 = ssub.s32 (%p1146_p4), 3, %s1151_s10  ;;  %s843_s29 = sshll.u32 (%p1146_p4), %s1134_s27, 4 }
  0x14   : > { %s811_s12 = sshll.u32 %s287_s11, 3  ;;  %p595_p8 = scmp.lt.s32.totalorder (%p1146_p4), %s594_s24, 2 }
  0x15   : > { %s289_s15 = scalar_lea.vmem %s1262_s0, %s811_s12  ;;  %s1228_s12 = scalar_lea.vmem (%p1146_p4), %s1269_s7, %s843_s29  }
  0x16   : > { %v301_v0 = vld [vmem:[%s289_s15] sm:$0xff]  ;;  %v302_v1 = vld [vmem:[%s289_s15 + $0x8] sm:$0xff]  ;;  %870 = vmatpush3.bf16.msra.mxu1 %v979_v51 }
  0x17   : > { %v304_v2 = vsel %vm303_vm0, %v301_v0, 0.0  ;;  %v307_v3 = vsel %vm303_vm0, %v302_v1, 0.0  ;;  %871 = vmatprep.subr.bf16.mxu1 %v1079_v15 }
  0x18   : > { %305 = vadd.xlane.f32.xlu0 %v304_v2  ;;  %v816_v2 = vld [vmem:[%s1266_s4] ss:$0 sm:$0xff] }
  0x1a   : > { %872 = vmatpush3.bf16.msra.mxu1 %v980_v52 }
  0x1c   : > { %308 = vadd.xlane.f32.xlu0 %v307_v3 }
  0xa5   : > { %v306_v4 = vpop.xlane.xlu0 %305 }
  0xa6   : > { %v311_v5 = vmul.f32 0.03125, %v306_v4 }
  0xa8   : > { %v313_v6 = vsub.f32 %v301_v0, %v311_v5  ;;  %v981_v0 = vld [vmem:[%s1267_s5] sm:$0xff]  }
  0xa9   : > { %v309_v7 = vpop.xlane.xlu0 %308 }
  0xaa   : > { %v312_v8 = vmul.f32 0.03125, %v309_v7  ;;  %v315_v9 = vmul.f32 %v313_v6, %v313_v6 }
  0xac   : > { %v314_v10 = vsub.f32 %v302_v1, %v312_v8  ;;  %v317_v11 = vsel %vm303_vm0, %v315_v9, 0.0  ;;  %v982_v1 = vld [vmem:[%s1267_s5 + $0x8] sm:$0xff]  }
  0xad   : > { %318 = vadd.xlane.f32.xlu1 %v317_v11 }
  0xae   : > { %v316_v12 = vmul.f32 %v314_v10, %v314_v10 }
  0xb0   : > { %v320_v13 = vsel %vm303_vm0, %v316_v12, 0.0  ;;  %v822_v12 = vld [vmem:[%s1268_s6] ss:$0 sm:$0xff] }
  0xb1   : > { %321 = vadd.xlane.f32.xlu1 %v320_v13 }
 0x13a   : > { %v319_v17 = vpop.xlane.xlu1 %318 }
 0x13b   : > { %v323_v18 = vmul.f32 0.03125, %v319_v17 }
 0x13d   : > { %v325_v19 = vadd.f32 1e-05, %v323_v18 }
 0x13e   : > { %v322_v20 = vpop.xlane.xlu1 %321 }
 0x13f   : > { %v324_v21 = vmul.f32 0.03125, %v322_v20  ;;  %983 = vrsqrt.f32 %v325_v19 }
 0x141   : > { %v326_v22 = vadd.f32 1e-05, %v324_v21 }
 0x143   : > { %985 = vrsqrt.f32 %v326_v22 }
 0x149   : > { %v984_v23 = vpop.eup %983 }
 0x14a   : > { %v329_v25 = vmul.f32 %v984_v23, %v313_v6 }
 0x14d   : > { %v986_v24 = vpop.eup %985 }
 0x14e   : > { %v330_v26 = vmul.f32 %v986_v24, %v314_v10 }
 0x150   : > { %v331_v27 = vpack.c.bf16 %v330_v26, %v329_v25 }
 0x152   : > { %862 = vmatmul.mubr.msk.bf16.vlgmr.msra.gmra.mrb[0].mxu0 %vm303_vm0, %v331_v27 }
 0x153   : > { %881 = vmatprep.mubr.msk.bf16.mxu0 %vm1080_vm1, %v1079_v15  ;;  %878 = vmatpush3.bf16.msra.mxu0 %v981_v0 }
 0x154   : > { %879 = vmatprep.subr.bf16.mxu0 %v1079_v15 }
 0x157   : > { %880 = vmatpush3.bf16.msra.mxu0 %v982_v1 }
 0x225   : > { %v392_v29 = vpop.f32.mrb[0].mxu0 }
 0x226   : > { %v393_v30 = vadd.f32 %v812_v28, %v392_v29  ;;  %v863_v31 = vpop.f32.mrb[1].mxu0 }
 0x227   : > { %v395_v32 = vpop.f32.mrb[2].mxu0 }
 0x228   : > { %v399_v33 = vmax.f32 %v393_v30, 0.0  ;;  %v396_v34 = vadd.f32 %v812_v28, %v395_v32  ;;  %v864_v35 = vpop.f32.mrb[3].mxu0 }
 0x22a   : > { %v400_v36 = vmax.f32 %v396_v34, 0.0  ;;  %v402_v37 = vsel %vm401_vm2, %v399_v33, 0.0 }
 0x22b   : > { %403 = vadd.xlane.f32.xlu0 %v402_v37 }
 0x22c   : > { %v405_v38 = vsel %vm401_vm2, %v400_v36, 0.0 }
 0x22d   : > { %406 = vadd.xlane.f32.xlu1 %v405_v38 }
 0x2b8   : > { %v404_v39 = vpop.xlane.xlu0 %403 }
 0x2b9   : > { %v409_v40 = vmul.f32 0.015625, %v404_v39 }
 0x2ba   : > { %v407_v41 = vpop.xlane.xlu1 %406 }
 0x2bb   : > { %v411_v42 = vsub.f32 %v399_v33, %v409_v40  ;;  %v410_v43 = vmul.f32 0.015625, %v407_v41 }
 0x2bd   : > { %v412_v44 = vsub.f32 %v400_v36, %v410_v43  ;;  %v413_v45 = vmul.f32 %v411_v42, %v411_v42 }
 0x2bf   : > { %v415_v46 = vsel %vm401_vm2, %v413_v45, 0.0  ;;  %v414_v47 = vmul.f32 %v412_v44, %v412_v44 }
 0x2c0   : > { %416 = vadd.xlane.f32.xlu0 %v415_v46 }
 0x2c1   : > { %v418_v48 = vsel %vm401_vm2, %v414_v47, 0.0 }
 0x2c2   : > { %419 = vadd.xlane.f32.xlu1 %v418_v48 }
 0x34d   : > { %v417_v53 = vpop.xlane.xlu0 %416 }
 0x34e   : > { %v421_v54 = vmul.f32 0.015625, %v417_v53 }
 0x34f   : > { %v420_v55 = vpop.xlane.xlu1 %419 }
 0x350   : > { %v423_v56 = vadd.f32 1e-05, %v421_v54  ;;  %v422_v57 = vmul.f32 0.015625, %v420_v55 }
 0x352   : > { %987 = vrsqrt.f32 %v423_v56  ;;  %v424_v58 = vadd.f32 1e-05, %v422_v57 }
 0x354   : > { %989 = vrsqrt.f32 %v424_v58 }
 0x35c   : > { %v988_v59 = vpop.eup %987 }
 0x35d   : > { %v427_v61 = vmul.f32 %v988_v59, %v411_v42 }
 0x35e   : > { %v990_v60 = vpop.eup %989 }
 0x35f   : > { %v428_v62 = vmul.f32 %v990_v60, %v412_v44 }
 0x361   : > { %v429_v63 = vpack.c.bf16 %v428_v62, %v427_v61 }
 0x363   : > { %874 = vmatmul.mubr.msk.bf16.vlgmr.msra.gmra.mrb[0].mxu1 %vm401_vm2, %v429_v63 }
 0x436   : > { %v506_v3 = vpop.f32.mrb[0].mxu1 }
 0x437   : > { %v507_v4 = vadd.f32 %v816_v2, %v506_v3  ;;  %v875_v5 = vpop.f32.mrb[1].mxu1 }
 0x438   : > { %v509_v6 = vpop.f32.mrb[2].mxu1 }
 0x439   : > { %v510_v7 = vadd.f32 %v816_v2, %v509_v6  ;;  %v876_v8 = vpop.f32.mrb[3].mxu1  ;;  %v513_v9 = vmax.f32 %v507_v4, 0.0 }
 0x43b   : > { %v514_v10 = vmax.f32 %v510_v7, 0.0 }
 0x43d   : > { %v515_v11 = vpack.c.bf16 %v514_v10, %v513_v9 }
 0x43f   : > { %882 = vmatmul.mubr.msk.bf16.vlgmr.msra.gmra.mrb[4].mxu0 %vm303_vm0, %v515_v11 }
 0x511   : > { %592 = sbr.rel (!%p1146_p4) target bundleno = 1353 (0x549), region = 52 }
 0x512   : > { %v576_v13 = vpop.f32.mrb[4].mxu0 }
 0x513   : > { %v577_v14 = vadd.f32 %v822_v12, %v576_v13  ;;  %v883_v15 = vpop.f32.mrb[5].mxu0 }
 0x514   : > { %v579_v16 = vpop.f32.mrb[6].mxu0 }
 0x515   : > { %584 = vst.msk [vmem:[%s1217_s26] sm:$0xff] %vm583_vm3, %v577_v14  ;;  %v580_v17 = vadd.f32 %v822_v12, %v579_v16  ;;  %v884_v18 = vpop.f32.mrb[7].mxu0 }
 0x517   : > { %585 = vst.msk [vmem:[%s1217_s26 + $0x8] sm:$0xff] %vm583_vm3, %v580_v17 }
 0x518   : > { %s1275_s24 = smov (!%p595_p8, %s594_s24), 2 }
 0x519   : > { %s828_s13 = sshll.u32 %s1275_s24, 7 }
 0x51a   : > { %p831_p9 = scmp.eq.s32.totalorder %s828_s13, 0 }
 0x51b   : > { %s1234_s14 = sshrl.u32 (!%p831_p9), %s1275_s24, 1 }
 0x51c   : > { %603 = sbr.rel (%p831_p9) target bundleno = 1353 (0x549), region = 56  ;;  %p832_p10 = scmp.le.s32.totalorder (!%p831_p9), %s1234_s14, 0 }
 0x523   : > { %761 = sbr.rel (%p832_p10) target bundleno = 1332 (0x534), region = 132  ;;  %s1047_s27 = smov (!%p832_p10), %s1228_s12  }
 0x524   : > { %s1051_s9 = smov (!%p832_p10), %s1217_s26   ;;  %s1055_s10 = smov (!%p832_p10), 0  }
 0x525   : > { %s1059_s15 = smov (!%p832_p10), 0  }
 0x52a LB: >> { %v667_v19 = vld [vmem:[%s1053_s9] sm:$0xff]  ;;  %v669_v20 = vld [vmem:[%s1053_s9 + $0x8] sm:$0xff]  ;;  %s671_s16 = sadd.s32 1, %s1057_s10  ;;  %s661_s15 = sadd.s32 1, %s1061_s15   ;;  %s1061_s15 = sphi %s1059_s15, %s661_s15   ;;  %s1057_s10 = sphi %s1055_s10, %s1056_s10   ;;  %s1053_s9 = sphi %s1051_s9, %s676_s9   ;;  %s1049_s27 = sphi %s1047_s27, %s677_s27  }
 0x52b   : >> { %668 = vst [vmem:[%s1049_s27] sm:$0xff] %v667_v19  ;;  %670 = vst [vmem:[%s1049_s27 + $0x8] sm:$0xff] %v669_v20  ;;  %p672_p11 = scmp.ge.s32.totalorder %s671_s16, %s1234_s14  ;;  %p660_p12 = scmp.ge.s32.totalorder %s661_s15, %s1234_s14 }
 0x52d   : >> { %s1277_s16 = smov (%p672_p11, %s671_s16), 0  ;;  %663 = sbr.rel (!%p660_p12) target bundleno = 1322 (0x52a), region = 138 }
 0x52e   : >> { %s833_s17 = sshll.u32 %s1277_s16, 4  ;;  %s1056_s10 = smov %s1277_s16  }
 0x52f   : >> { %s676_s9 = scalar_lea.vmem %s1217_s26, %s833_s17 [#allocation2]   ;;  %s677_s27 = scalar_lea.vmem %s1228_s12, %s833_s17  }
 0x534 PF: > { %s1244_s18 = sand.u32 1, %s1275_s24   ;;  %s844_s19 = sshll.u32 %s1234_s14, 4 }
 0x535   : > { %s682_s20 = scalar_lea.vmem %s1217_s26, %s844_s19 [#allocation2]   ;;  %s684_s21 = scalar_lea.vmem %s1228_s12, %s844_s19  }
 0x536   : > { %p838_p13 = scmp.le.s32.totalorder %s1244_s18, 0 }
 0x537   : > { %s1063_s22 = smov (!%p838_p13), %s684_s21   ;;  %s1067_s23 = smov (!%p838_p13), %s682_s20  }
 0x538   : > { %775 = sbr.rel (%p838_p13) target bundleno = 1353 (0x549), region = 143  ;;  %s1071_s29 = smov (!%p838_p13), 0  }
 0x539   : > { %s1075_s30 = smov (!%p838_p13), 0  }
 0x53f LB: >> { %v694_v21 = vld [vmem:[%s1069_s23] sm:$0xff]  ;;  %s696_s24 = sadd.s32 1, %s1073_s29  ;;  %s688_s30 = sadd.s32 1, %s1077_s30   ;;  %s1077_s30 = sphi %s1075_s30, %s688_s30   ;;  %s1073_s29 = sphi %s1071_s29, %s1072_s29   ;;  %s1069_s23 = sphi %s1067_s23, %s701_s23   ;;  %s1065_s22 = sphi %s1063_s22, %s702_s22  }
 0x540   : >> { %695 = vst [vmem:[%s1065_s22] sm:$0xff] %v694_v21  ;;  %p697_p0 = scmp.ge.s32.totalorder %s696_s24, %s1244_s18  ;;  %p687_p1 = scmp.ge.s32.totalorder %s688_s30, %s1244_s18 }
 0x542   : >> { %s1279_s24 = smov (%p697_p0, %s696_s24), 0  ;;  %690 = sbr.rel (!%p687_p1) target bundleno = 1343 (0x53f), region = 149 }
 0x543   : >> { %s839_s26 = sshll.u32 %s1279_s24, 3  ;;  %s1072_s29 = smov %s1279_s24  }
 0x544   : >> { %s701_s23 = scalar_lea.vmem %s682_s20, %s839_s26 [#allocation2]   ;;  %s702_s22 = scalar_lea.vmem %s684_s21, %s839_s26  }
 0x549 PF: > { %p14_p2 = scmp.ge.s32.totalorder %s1136_s28, 4   ;;  %s1271_s24 = smov %s1041_s25 }
 0x54a   : > { %s1272_s25 = smov %s1144_s8  ;;  %s1273_s26 = smov %s1136_s28 }
 0x54b   :  { %16 = sbr.rel (!%p14_p2) target bundleno = 2 (0x2), region = 160 }

</bundles_post_ra>
